<compile_context>
chip_gen: v7x
topology: tpu7x:2x2x1
jax: 0.10.0
libtpu: 0.0.40
codegen_flags: <defaults>
</compile_context>

<pallas_src>
import numpy as np
import jax
import jax.numpy as jnp
from jax import lax
from jax.experimental import pallas as pl
from jax.experimental.pallas import tpu as pltpu

_UNROLL_T = 16  # fully unroll the recurrence up to this T; fori_loop beyond


def esn_kernel(x_ref, h0_ref, win_ref, w_ref, wout_ref, y_ref, xp_ref, h_all):
    TB, _ = x_ref.shape
    B, H = h0_ref.shape
    T = TB // B

    # 1) Project the whole input sequence in a single MXU matmul, off the
    #    recurrence critical path: (T*B, I) @ (I, H) -> (T*B, H), time-major.
    xp_ref[...] = jnp.dot(x_ref[...], win_ref[...],
                          preferred_element_type=jnp.float32)

    w = w_ref[...]  # hoisted once; live across the whole recurrence

    def step(t, h):
        row = t * B
        x_t = xp_ref[pl.ds(row, B), :]                        # contiguous rows
        h = jnp.tanh(x_t + jnp.dot(h, w, preferred_element_type=jnp.float32))
        h_all[pl.ds(row, B), :] = h                           # contiguous store
        return h

    # 2) Recurrence: one MXU dot + VPU add + EUP tanh per step on the serial
    #    dependency chain. Unroll only small T (review: unbounded Python
    #    unrolls inflate program size / spill vregs for large T).
    if T <= _UNROLL_T:
        h = h0_ref[...]
        for t in range(T):
            h = step(t, h)
    else:
        lax.fori_loop(0, T, step, h0_ref[...], unroll=2)

    # 3) Batched readout: one (T*B, H) @ (H, O) matmul and ONE store. Bias is
    #    folded in the wrapper, so no padded (1, O) bias tile in VMEM.
    y_ref[...] = jnp.dot(h_all[...], wout_ref[...],
                         preferred_element_type=jnp.float32)


def esn_forward(x_btc, h0, Win, W, Wout, b):
    """x_btc: (B, T, I) float32 -> y: (B, T, O) float32."""
    B, T, I = x_btc.shape
    H = Win.shape[1]
    O = Wout.shape[1]

    # Wrapper-side layout plumbing (free): time-major, 2D input for the kernel.
    x_tb = x_btc.transpose(1, 0, 2).reshape(T * B, I).astype(jnp.float32)

    # Explicit VMEM budget: 2x (default double-buffering) on I/O + scratches,
    # with headroom; clamped so the same kernel fits v7x's 64 MiB VMEM.
    f32 = 4
    io_bytes = f32 * (T * B * I + B * H + I * H + H * H + H * O + T * B * O)
    scratch_bytes = f32 * (2 * T * B * H)
    vmem_limit = int(min(64 << 20, max(32 << 20,
                                       2 * io_bytes + scratch_bytes + (4 << 20))))

    y_tb = pl.pallas_call(
        esn_kernel,
        out_shape=jax.ShapeDtypeStruct((T * B, O), jnp.float32),
        grid_spec=pltpu.PrefetchScalarGridSpec(
            num_scalar_prefetch=0,
            grid=(1,),  # single invocation: whole (tiny) sequence in VMEM
            in_specs=[
                pl.BlockSpec((T * B, I), lambda i: (0, 0)),   # x, time-major 2D
                pl.BlockSpec((B, H), lambda i: (0, 0)),       # h0
                pl.BlockSpec((I, H), lambda i: (0, 0)),       # Win
                pl.BlockSpec((H, H), lambda i: (0, 0)),       # W
                pl.BlockSpec((H, O), lambda i: (0, 0)),       # Wout
            ],
            out_specs=pl.BlockSpec((T * B, O), lambda i: (0, 0)),
            scratch_shapes=[
                pltpu.VMEM((T * B, H), jnp.float32),          # xp (projected x)
                pltpu.VMEM((T * B, H), jnp.float32),          # hidden record
            ],
        ),
        compiler_params=pltpu.CompilerParams(
            # Recurrence is inherently sequential; single grid point anyway.
            dimension_semantics=("arbitrary",),
            vmem_limit_bytes=vmem_limit,
        ),
    )(x_tb, h0, Win, W, Wout)

    # Wrapper-side: bias add + back to (B, T, O).
    return y_tb.reshape(T, B, O).transpose(1, 0, 2) + b.reshape(1, 1, O)


def init_esn_params(key, input_size, hidden_size, output_size,
                    spectrum_radius=0.9, input_connectivity=1.0,
                    hidden_connectivity=1.0):
    """Deterministic parameter init mirroring ESN.__init__ shapes/semantics."""
    k_win, k_mi, k_w, k_mh, k_lw, k_lb = jax.random.split(key, 6)

    # Win = rand(I, H) * 0.2 - 0.1, masked by input connectivity
    Win = jax.random.uniform(k_win, (input_size, hidden_size)) * 0.2 - 0.1
    mask_in = (jax.random.uniform(k_mi, (input_size, hidden_size))
               < input_connectivity).astype(jnp.float32)
    Win = Win * mask_in

    # W = randn(H, H) * 0.1, masked, rescaled to given spectral radius
    W = jax.random.normal(k_w, (hidden_size, hidden_size)) * 0.1
    mask_h = (jax.random.uniform(k_mh, (hidden_size, hidden_size))
              < hidden_connectivity).astype(jnp.float32)
    W = W * mask_h
    # TODO(synk): spectral radius (torch.linalg.eig) has no TPU kernel; computed on host.
    eigvals = np.linalg.eigvals(np.asarray(W, dtype=np.float64))
    rho = float(np.max(np.abs(eigvals)))
    W = W * (spectrum_radius / rho)

    # nn.Linear(hidden_size, output_size): weight (O, H), bias (O,)
    bound = 1.0 / np.sqrt(hidden_size)
    lin_w = jax.random.uniform(k_lw, (output_size, hidden_size),
                               minval=-bound, maxval=bound)
    lin_b = jax.random.uniform(k_lb, (output_size,),
                               minval=-bound, maxval=bound)
    Wout = lin_w.T  # (H, O) so kernel does h @ Wout, bias added in wrapper

    return (Win.astype(jnp.float32), W.astype(jnp.float32),
            Wout.astype(jnp.float32), lin_b.astype(jnp.float32))


def esn_reference(x_btc, h0, Win, W, Wout, b):
    """Pure-JAX reference mirroring the PyTorch loop."""
    B, T, I = x_btc.shape
    h = h0
    ys = []
    for i in range(T):
        h = jnp.tanh(x_btc[:, i] @ Win + h @ W)
        ys.append(h @ Wout + b)
    return jnp.stack(ys, axis=1)


if __name__ == "__main__":
    # Small shapes consistent with the module's forward contract.
    batch = 2
    num_iters = 8       # sequence length T == num_iters
    input_size = 4
    hidden_size = 32
    output_size = 1

    key = jax.random.PRNGKey(0)
    k_param, k_x, k_h = jax.random.split(key, 3)

    Win, W, Wout, b = init_esn_params(
        k_param, input_size, hidden_size, output_size,
        spectrum_radius=0.9, input_connectivity=1.0, hidden_connectivity=1.0)

    x = jax.random.normal(k_x, (batch, num_iters, input_size), dtype=jnp.float32)
    # torch.randn initial hidden state -> passed explicitly for determinism
    h0 = jax.random.normal(k_h, (batch, hidden_size), dtype=jnp.float32)

    y = esn_forward(x, h0, Win, W, Wout, b)
    jax.block_until_ready(y)

    y_ref = esn_reference(x, h0, Win, W, Wout, b)
    np.testing.assert_allclose(np.asarray(y), np.asarray(y_ref),
                               rtol=1e-5, atol=1e-5)
    assert y.shape == (batch, num_iters, output_size)

    print("KERNEL_OK")
</pallas_src>

<mosaic_0001>
module attributes {stable_mosaic.version = 11 : i64} {
  func.func @esn_kernel(%arg0: i32, %arg1: memref<16x4xf32, #tpu.memory_space<vmem>>, %arg2: memref<2x32xf32, #tpu.memory_space<vmem>>, %arg3: memref<4x32xf32, #tpu.memory_space<vmem>>, %arg4: memref<32x32xf32, #tpu.memory_space<vmem>>, %arg5: memref<32x1xf32, #tpu.memory_space<vmem>>, %arg6: memref<16x1xf32, #tpu.memory_space<vmem>>, %arg7: memref<16x32xf32, #tpu.memory_space<vmem>>, %arg8: memref<16x32xf32, #tpu.memory_space<vmem>>) attributes {dimension_semantics = [#tpu.dimension_semantics<arbitrary>], iteration_bounds = array<i64: 1>, scalar_prefetch = 0 : i64, scratch_operands = 2 : i64, tpu.core_type = #tpu.core_type<tc>, window_params = [{pipeline_mode = #tpu.pipeline_mode<synchronous>, transform_indices = @transform_0, window_bounds = array<i64: 16, 4>}, {pipeline_mode = #tpu.pipeline_mode<synchronous>, transform_indices = @transform_1, window_bounds = array<i64: 2, 32>}, {pipeline_mode = #tpu.pipeline_mode<synchronous>, transform_indices = @transform_2, window_bounds = array<i64: 4, 32>}, {pipeline_mode = #tpu.pipeline_mode<synchronous>, transform_indices = @transform_3, window_bounds = array<i64: 32, 32>}, {pipeline_mode = #tpu.pipeline_mode<synchronous>, transform_indices = @transform_4, window_bounds = array<i64: 32, 1>}, {pipeline_mode = #tpu.pipeline_mode<synchronous>, transform_indices = @transform_5, window_bounds = array<i64: 16, 1>}]} {
    %c0 = arith.constant 0 : index
    %c0_0 = arith.constant 0 : index
    %0 = vector.load %arg1[%c0, %c0_0] : memref<16x4xf32, #tpu.memory_space<vmem>>, vector<16x4xf32>
    %c0_1 = arith.constant 0 : index
    %c0_2 = arith.constant 0 : index
    %1 = vector.load %arg3[%c0_1, %c0_2] : memref<4x32xf32, #tpu.memory_space<vmem>>, vector<4x32xf32>
    %cst = arith.constant dense<0.000000e+00> : vector<16x32xf32>
    %2 = tpu.matmul %0, %1, %cst {dimension_numbers = #tpu.dot_dimension_numbers<[1], [0], [0], [1], [0, 0, 1, 1], [], []>} : vector<16x4xf32>, vector<4x32xf32>, vector<16x32xf32> -> vector<16x32xf32>
    %c0_3 = arith.constant 0 : index
    %c0_4 = arith.constant 0 : index
    %3 = vector.load %arg7[%c0_3, %c0_4] : memref<16x32xf32, #tpu.memory_space<vmem>>, vector<16x32xf32>
    tpu.vector_store %arg7[%c0_3, %c0_4], %2 {strides = array<i32>} : memref<16x32xf32, #tpu.memory_space<vmem>>, vector<16x32xf32>,
    %c0_5 = arith.constant 0 : index
    %c0_6 = arith.constant 0 : index
    %4 = vector.load %arg4[%c0_5, %c0_6] : memref<32x32xf32, #tpu.memory_space<vmem>>, vector<32x32xf32>
    %c0_7 = arith.constant 0 : index
    %c0_8 = arith.constant 0 : index
    %5 = vector.load %arg2[%c0_7, %c0_8] : memref<2x32xf32, #tpu.memory_space<vmem>>, vector<2x32xf32>
    %c0_9 = arith.constant 0 : index
    %c0_10 = arith.constant 0 : index
    %6 = vector.load %arg7[%c0_9, %c0_10] : memref<16x32xf32, #tpu.memory_space<vmem>>, vector<2x32xf32>
    %cst_11 = arith.constant dense<0.000000e+00> : vector<2x32xf32>
    %7 = tpu.matmul %5, %4, %cst_11 {dimension_numbers = #tpu.dot_dimension_numbers<[1], [0], [0], [1], [0, 0, 1, 1], [], []>} : vector<2x32xf32>, vector<32x32xf32>, vector<2x32xf32> -> vector<2x32xf32>
    %8 = arith.addf %6, %7 : vector<2x32xf32>
    %9 = math.tanh %8 : vector<2x32xf32>
    %c0_12 = arith.constant 0 : index
    %c0_13 = arith.constant 0 : index
    %10 = vector.load %arg8[%c0_12, %c0_13] : memref<16x32xf32, #tpu.memory_space<vmem>>, vector<2x32xf32>
    tpu.vector_store %arg8[%c0_12, %c0_13], %9 {strides = array<i32>} : memref<16x32xf32, #tpu.memory_space<vmem>>, vector<2x32xf32>,
    %c2 = arith.constant 2 : index
    %c0_14 = arith.constant 0 : index
    %11 = vector.load %arg7[%c2, %c0_14] : memref<16x32xf32, #tpu.memory_space<vmem>>, vector<2x32xf32>
    %cst_15 = arith.constant dense<0.000000e+00> : vector<2x32xf32>
    %12 = tpu.matmul %9, %4, %cst_15 {dimension_numbers = #tpu.dot_dimension_numbers<[1], [0], [0], [1], [0, 0, 1, 1], [], []>} : vector<2x32xf32>, vector<32x32xf32>, vector<2x32xf32> -> vector<2x32xf32>
    %13 = arith.addf %11, %12 : vector<2x32xf32>
    %14 = math.tanh %13 : vector<2x32xf32>
    %c2_16 = arith.constant 2 : index
    %c0_17 = arith.constant 0 : index
    %15 = vector.load %arg8[%c2_16, %c0_17] : memref<16x32xf32, #tpu.memory_space<vmem>>, vector<2x32xf32>
    tpu.vector_store %arg8[%c2_16, %c0_17], %14 {strides = array<i32>} : memref<16x32xf32, #tpu.memory_space<vmem>>, vector<2x32xf32>,
    %c4 = arith.constant 4 : index
    %c0_18 = arith.constant 0 : index
    %16 = vector.load %arg7[%c4, %c0_18] : memref<16x32xf32, #tpu.memory_space<vmem>>, vector<2x32xf32>
    %cst_19 = arith.constant dense<0.000000e+00> : vector<2x32xf32>
    %17 = tpu.matmul %14, %4, %cst_19 {dimension_numbers = #tpu.dot_dimension_numbers<[1], [0], [0], [1], [0, 0, 1, 1], [], []>} : vector<2x32xf32>, vector<32x32xf32>, vector<2x32xf32> -> vector<2x32xf32>
    %18 = arith.addf %16, %17 : vector<2x32xf32>
    %19 = math.tanh %18 : vector<2x32xf32>
    %c4_20 = arith.constant 4 : index
    %c0_21 = arith.constant 0 : index
    %20 = vector.load %arg8[%c4_20, %c0_21] : memref<16x32xf32, #tpu.memory_space<vmem>>, vector<2x32xf32>
    tpu.vector_store %arg8[%c4_20, %c0_21], %19 {strides = array<i32>} : memref<16x32xf32, #tpu.memory_space<vmem>>, vector<2x32xf32>,
    %c6 = arith.constant 6 : index
    %c0_22 = arith.constant 0 : index
    %21 = vector.load %arg7[%c6, %c0_22] : memref<16x32xf32, #tpu.memory_space<vmem>>, vector<2x32xf32>
    %cst_23 = arith.constant dense<0.000000e+00> : vector<2x32xf32>
    %22 = tpu.matmul %19, %4, %cst_23 {dimension_numbers = #tpu.dot_dimension_numbers<[1], [0], [0], [1], [0, 0, 1, 1], [], []>} : vector<2x32xf32>, vector<32x32xf32>, vector<2x32xf32> -> vector<2x32xf32>
    %23 = arith.addf %21, %22 : vector<2x32xf32>
    %24 = math.tanh %23 : vector<2x32xf32>
    %c6_24 = arith.constant 6 : index
    %c0_25 = arith.constant 0 : index
    %25 = vector.load %arg8[%c6_24, %c0_25] : memref<16x32xf32, #tpu.memory_space<vmem>>, vector<2x32xf32>
    tpu.vector_store %arg8[%c6_24, %c0_25], %24 {strides = array<i32>} : memref<16x32xf32, #tpu.memory_space<vmem>>, vector<2x32xf32>,
    %c8 = arith.constant 8 : index
    %c0_26 = arith.constant 0 : index
    %26 = vector.load %arg7[%c8, %c0_26] : memref<16x32xf32, #tpu.memory_space<vmem>>, vector<2x32xf32>
    %cst_27 = arith.constant dense<0.000000e+00> : vector<2x32xf32>
    %27 = tpu.matmul %24, %4, %cst_27 {dimension_numbers = #tpu.dot_dimension_numbers<[1], [0], [0], [1], [0, 0, 1, 1], [], []>} : vector<2x32xf32>, vector<32x32xf32>, vector<2x32xf32> -> vector<2x32xf32>
    %28 = arith.addf %26, %27 : vector<2x32xf32>
    %29 = math.tanh %28 : vector<2x32xf32>
    %c8_28 = arith.constant 8 : index
    %c0_29 = arith.constant 0 : index
    %30 = vector.load %arg8[%c8_28, %c0_29] : memref<16x32xf32, #tpu.memory_space<vmem>>, vector<2x32xf32>
    tpu.vector_store %arg8[%c8_28, %c0_29], %29 {strides = array<i32>} : memref<16x32xf32, #tpu.memory_space<vmem>>, vector<2x32xf32>,
    %c10 = arith.constant 10 : index
    %c0_30 = arith.constant 0 : index
    %31 = vector.load %arg7[%c10, %c0_30] : memref<16x32xf32, #tpu.memory_space<vmem>>, vector<2x32xf32>
    %cst_31 = arith.constant dense<0.000000e+00> : vector<2x32xf32>
    %32 = tpu.matmul %29, %4, %cst_31 {dimension_numbers = #tpu.dot_dimension_numbers<[1], [0], [0], [1], [0, 0, 1, 1], [], []>} : vector<2x32xf32>, vector<32x32xf32>, vector<2x32xf32> -> vector<2x32xf32>
    %33 = arith.addf %31, %32 : vector<2x32xf32>
    %34 = math.tanh %33 : vector<2x32xf32>
    %c10_32 = arith.constant 10 : index
    %c0_33 = arith.constant 0 : index
    %35 = vector.load %arg8[%c10_32, %c0_33] : memref<16x32xf32, #tpu.memory_space<vmem>>, vector<2x32xf32>
    tpu.vector_store %arg8[%c10_32, %c0_33], %34 {strides = array<i32>} : memref<16x32xf32, #tpu.memory_space<vmem>>, vector<2x32xf32>,
    %c12 = arith.constant 12 : index
    %c0_34 = arith.constant 0 : index
    %36 = vector.load %arg7[%c12, %c0_34] : memref<16x32xf32, #tpu.memory_space<vmem>>, vector<2x32xf32>
    %cst_35 = arith.constant dense<0.000000e+00> : vector<2x32xf32>
    %37 = tpu.matmul %34, %4, %cst_35 {dimension_numbers = #tpu.dot_dimension_numbers<[1], [0], [0], [1], [0, 0, 1, 1], [], []>} : vector<2x32xf32>, vector<32x32xf32>, vector<2x32xf32> -> vector<2x32xf32>
    %38 = arith.addf %36, %37 : vector<2x32xf32>
    %39 = math.tanh %38 : vector<2x32xf32>
    %c12_36 = arith.constant 12 : index
    %c0_37 = arith.constant 0 : index
    %40 = vector.load %arg8[%c12_36, %c0_37] : memref<16x32xf32, #tpu.memory_space<vmem>>, vector<2x32xf32>
    tpu.vector_store %arg8[%c12_36, %c0_37], %39 {strides = array<i32>} : memref<16x32xf32, #tpu.memory_space<vmem>>, vector<2x32xf32>,
    %c14 = arith.constant 14 : index
    %c0_38 = arith.constant 0 : index
    %41 = vector.load %arg7[%c14, %c0_38] : memref<16x32xf32, #tpu.memory_space<vmem>>, vector<2x32xf32>
    %cst_39 = arith.constant dense<0.000000e+00> : vector<2x32xf32>
    %42 = tpu.matmul %39, %4, %cst_39 {dimension_numbers = #tpu.dot_dimension_numbers<[1], [0], [0], [1], [0, 0, 1, 1], [], []>} : vector<2x32xf32>, vector<32x32xf32>, vector<2x32xf32> -> vector<2x32xf32>
    %43 = arith.addf %41, %42 : vector<2x32xf32>
    %44 = math.tanh %43 : vector<2x32xf32>
    %c14_40 = arith.constant 14 : index
    %c0_41 = arith.constant 0 : index
    %45 = vector.load %arg8[%c14_40, %c0_41] : memref<16x32xf32, #tpu.memory_space<vmem>>, vector<2x32xf32>
    tpu.vector_store %arg8[%c14_40, %c0_41], %44 {strides = array<i32>} : memref<16x32xf32, #tpu.memory_space<vmem>>, vector<2x32xf32>,
    %c0_42 = arith.constant 0 : index
    %c0_43 = arith.constant 0 : index
    %46 = vector.load %arg8[%c0_42, %c0_43] : memref<16x32xf32, #tpu.memory_space<vmem>>, vector<16x32xf32>
    %c0_44 = arith.constant 0 : index
    %c0_45 = arith.constant 0 : index
    %47 = vector.load %arg5[%c0_44, %c0_45] : memref<32x1xf32, #tpu.memory_space<vmem>>, vector<32x1xf32>
    %cst_46 = arith.constant dense<0.000000e+00> : vector<16x1xf32>
    %48 = tpu.matmul %46, %47, %cst_46 {dimension_numbers = #tpu.dot_dimension_numbers<[1], [0], [0], [1], [0, 0, 1, 1], [], []>} : vector<16x32xf32>, vector<32x1xf32>, vector<16x1xf32> -> vector<16x1xf32>
    %c0_47 = arith.constant 0 : index
    %c0_48 = arith.constant 0 : index
    %49 = vector.load %arg6[%c0_47, %c0_48] : memref<16x1xf32, #tpu.memory_space<vmem>>, vector<16x1xf32>
    tpu.vector_store %arg6[%c0_47, %c0_48], %48 {strides = array<i32>} : memref<16x1xf32, #tpu.memory_space<vmem>>, vector<16x1xf32>,
    return
  }
  func.func @transform_0(%arg0: i32) -> (i32, i32) {
    %c0_i32 = arith.constant 0 : i32
    %c0_i32_0 = arith.constant 0 : i32
    %c0_i32_1 = arith.constant 0 : i32
    return %c0_i32, %c0_i32_0 : i32, i32
  }
  func.func @transform_1(%arg0: i32) -> (i32, i32) {
    %c0_i32 = arith.constant 0 : i32
    %c0_i32_0 = arith.constant 0 : i32
    %c0_i32_1 = arith.constant 0 : i32
    return %c0_i32, %c0_i32_0 : i32, i32
  }
  func.func @transform_2(%arg0: i32) -> (i32, i32) {
    %c0_i32 = arith.constant 0 : i32
    %c0_i32_0 = arith.constant 0 : i32
    %c0_i32_1 = arith.constant 0 : i32
    return %c0_i32, %c0_i32_0 : i32, i32
  }
  func.func @transform_3(%arg0: i32) -> (i32, i32) {
    %c0_i32 = arith.constant 0 : i32
    %c0_i32_0 = arith.constant 0 : i32
    %c0_i32_1 = arith.constant 0 : i32
    return %c0_i32, %c0_i32_0 : i32, i32
  }
  func.func @transform_4(%arg0: i32) -> (i32, i32) {
    %c0_i32 = arith.constant 0 : i32
    %c0_i32_0 = arith.constant 0 : i32
    %c0_i32_1 = arith.constant 0 : i32
    return %c0_i32, %c0_i32_0 : i32, i32
  }
  func.func @transform_5(%arg0: i32) -> (i32, i32) {
    %c0_i32 = arith.constant 0 : i32
    %c0_i32_0 = arith.constant 0 : i32
    %c0_i32_1 = arith.constant 0 : i32
    return %c0_i32, %c0_i32_0 : i32, i32
  }
}

</mosaic_0001>

<bundles_post_ra>
// kernel: tpu_custom_call.1
= control target key start
LH: loop header
LB: loop body
LE: loop exit
PB: predicated region body
PF: predicated region fallthrough
CT: control target
= control target key end

     0   :  { %vm30_vm0 = vcmask 1043456   ;;  %vm23_vm1 = vcmask 31744   ;;  %v1069_v3 = vmov 0.0|0.0   ;;  %vm1070_vm2 = vmmov 0   ;;  %s1218_s2 = inlined_call_operand.vmem [shape: f32[4,32], index: 2, kind: input, shape index: {}]   ;;  %s1219_s0 = inlined_call_operand.vmem [shape: f32[16,4], index: 0, kind: input, shape index: {}]   ;;  %s1220_s3 = inlined_call_operand.vmem [shape: f32[32,32], index: 3, kind: input, shape index: {}]   ;;  %s1221_s1 = inlined_call_operand.vmem [shape: f32[2,32], index: 1, kind: input, shape index: {}]   ;;  %s1222_s4 = inlined_call_operand.vmem [shape: f32[32,1], index: 4, kind: input, shape index: {}]   ;;  %s1223_s5 = inlined_call_operand.vmem [shape: f32[16,1], index: 5, kind: output, shape index: {}]  }
   0x1   :  { %v22_v0 = vld [vmem:[%s1218_s2] sm:$0xf]  ;;  %v21_v2 = vld [vmem:[%s1219_s0 + $0x8] sm:$0xff]  ;;  %994 = vmatprep.subr.bf16.mxu1 %v1069_v3  ;;  %v114_v6 = vld [vmem:[%s1220_s3 + $0x10] sm:$0xff]  ;;  %v1071_v9 = vmov 0.0   ;;  %vm109_vm3 = vcmask 261120  }
   0x2   :  { %v20_v1 = vld [vmem:[%s1219_s0] sm:$0xff]  ;;  %890 = vmatprep.subr.msk.mxu0 %vm30_vm0, %v22_v0  ;;  %v113_v5 = vld [vmem:[%s1220_s3 + $0x8] sm:$0xff]  ;;  %v115_v8 = vld [vmem:[%s1220_s3 + $0x18] sm:$0xff]  ;;  %903 = vmatprep.mubr.msk.f32.mxu1 %vm1070_vm2, %v1071_v9  ;;  %vm193_vm4 = vcmask 254976   ;;  %vm821_vm5 = vcmask 7168  }
   0x3   :  { %892 = vmatprep.mubr.msk.f32.mxu0 %vm23_vm1, %v20_v1  ;;  %v112_v4 = vld [vmem:[%s1220_s3] sm:$0xff]  ;;  %891 = vmatpush3.msk.msra.mxu0 %vm30_vm0, %v22_v0  ;;  %v1132_v10 = vpack.c.bf16 %v115_v8, %v114_v6  ;;  %v737_v51 = vld [vmem:[%s1222_s4 + $0x8] sm:$0xff]  ;;  %v738_v52 = vld [vmem:[%s1222_s4 + $0x10] sm:$0xff] }
   0x4   :  { %v1122_v7 = vpack.c.bf16 %v113_v5, %v112_v4  ;;  %893 = vmatmul.mubr.msk.f32.vlgmr.msra.gmra.mrb[0].mxu0 %vm23_vm1, %v21_v2  ;;  %1000 = vmatprep.subr.bf16.mxu0 %v1069_v3  ;;  %v116_v11 = vld [vmem:[%s1221_s1] sm:$0x3]  ;;  %v739_v54 = vld [vmem:[%s1222_s4 + $0x18] sm:$0xff] }
   0x5   :  { %914 = vmatprep.mubr.msk.f32.mxu0 %vm1070_vm2, %v1071_v9  ;;  %v736_v50 = vld [vmem:[%s1222_s4] sm:$0xff]  ;;  %v1046_v55 = vpack.c.bf16 %v739_v54, %v738_v52 }
   0x6   :  { %996 = vmatpush3.bf16.msra.mxu1 %v1122_v7  ;;  %1002 = vmatpush3.bf16.msra.mxu0 %v1122_v7  ;;  %v1042_v53 = vpack.c.bf16 %v737_v51, %v736_v50 }
   0x7   :  { %997 = vmatprep.subr.bf16.mxu1 %v1069_v3  ;;  %1003 = vmatprep.subr.bf16.mxu0 %v1069_v3 }
   0xa   :  { %999 = vmatpush3.bf16.msra.mxu1 %v1132_v10  ;;  %1005 = vmatpush3.bf16.msra.mxu0 %v1132_v10 }
   0xb   :  { %1006 = vmatprep.subr.bf16.mxu1 %v1069_v3  ;;  %1012 = vmatprep.subr.bf16.mxu0 %v1069_v3 }
   0xd   :  { %904 = vmatmul.mubr.msk.f32.vlgmr.msra.gmra.mrb[0].mxu1 %vm109_vm3, %v116_v11 }
   0xe   :  { %1008 = vmatpush3.bf16.msra.mxu1 %v1122_v7  ;;  %925 = vmatprep.mubr.msk.f32.mxu1 %vm1070_vm2, %v1071_v9 }
   0xf   :  { %1009 = vmatprep.subr.bf16.mxu1 %v1069_v3 }
  0x12   :  { %1011 = vmatpush3.bf16.msra.mxu1 %v1132_v10 }
  0x13   :  { %1018 = vmatprep.subr.bf16.mxu1 %v1069_v3 }
  0xd7   :  { %v894_v12 = vpop.f32.mrb[0].mxu0 }
  0xd8   :  { %111 = vst.msk [vmem:[#allocation2 + $0x8] sm:$0xff] %vm109_vm3, %v894_v12  ;;  %v100_v13 = vpop.f32.mrb[1].mxu0 }
  0xd9   :  { %110 = vst.msk [vmem:[#allocation2] sm:$0xff] %vm109_vm3, %v100_v13 }
  0xdf   :  { %v426_v34 = vld [vmem:[#allocation2 + $0x8] sm:$0x3]  ;;  %v503_v39 = vld [vmem:[#allocation2 + $0xa] sm:$0x3]  ;;  %v580_v45 = vld [vmem:[#allocation2 + $0xc] sm:$0x3] }
  0xe0   :  { %v187_v14 = vpop.f32.mrb[0].mxu1  ;;  %v117_v15 = vld [vmem:[#allocation2] sm:$0x3]  ;;  %v195_v19 = vld [vmem:[#allocation2 + $0x2] sm:$0x3] }
  0xe1   :  { %v905_v16 = vpop.f32.mrb[1].mxu1  ;;  %v191_v17 = vadd.f32 %v187_v14, %v117_v15  ;;  %v272_v24 = vld [vmem:[#allocation2 + $0x4] sm:$0x3]  ;;  %v349_v29 = vld [vmem:[#allocation2 + $0x6] sm:$0x3] }
  0xe2   :  { %v657_v56 = vld [vmem:[#allocation2 + $0xe] sm:$0x3] }
  0xe3   :  { %1053 = vtanh.f32 %v191_v17 }
  0xed   :  { %v1054_v18 = vpop.eup %1053 }
  0xee   :  { %194 = vst.msk [vmem:[#allocation3] sm:$0x3] %vm193_vm4, %v1054_v18  ;;  %915 = vmatmul.mubr.msk.f32.vlgmr.msra.gmra.mrb[2].mxu0 %vm109_vm3, %v1054_v18 }
  0xef   :  { %1014 = vmatpush3.bf16.msra.mxu0 %v1122_v7  ;;  %936 = vmatprep.mubr.msk.f32.mxu0 %vm1070_vm2, %v1071_v9 }
  0xf0   :  { %1015 = vmatprep.subr.bf16.mxu0 %v1069_v3 }
  0xf3   :  { %1017 = vmatpush3.bf16.msra.mxu0 %v1132_v10 }
  0xf4   :  { %1024 = vmatprep.subr.bf16.mxu0 %v1069_v3 }
 0x1c1   :  { %v265_v20 = vpop.f32.mrb[2].mxu0 }
 0x1c2   :  { %v269_v21 = vadd.f32 %v265_v20, %v195_v19  ;;  %v916_v22 = vpop.f32.mrb[3].mxu0 }
 0x1c4   :  { %1055 = vtanh.f32 %v269_v21 }
 0x1ce   :  { %v1056_v23 = vpop.eup %1055 }
 0x1cf   :  { %271 = vst.msk [vmem:[#allocation3 + $0x2] sm:$0x3] %vm193_vm4, %v1056_v23  ;;  %926 = vmatmul.mubr.msk.f32.vlgmr.msra.gmra.mrb[2].mxu1 %vm109_vm3, %v1056_v23 }
 0x1d0   :  { %1020 = vmatpush3.bf16.msra.mxu1 %v1122_v7  ;;  %947 = vmatprep.mubr.msk.f32.mxu1 %vm1070_vm2, %v1071_v9 }
 0x1d1   :  { %1021 = vmatprep.subr.bf16.mxu1 %v1069_v3 }
 0x1d4   :  { %1023 = vmatpush3.bf16.msra.mxu1 %v1132_v10 }
 0x1d5   :  { %1030 = vmatprep.subr.bf16.mxu1 %v1069_v3 }
 0x2a2   :  { %v342_v25 = vpop.f32.mrb[2].mxu1 }
 0x2a3   :  { %v346_v26 = vadd.f32 %v342_v25, %v272_v24  ;;  %v927_v27 = vpop.f32.mrb[3].mxu1 }
 0x2a5   :  { %1057 = vtanh.f32 %v346_v26 }
 0x2af   :  { %v1058_v28 = vpop.eup %1057 }
 0x2b0   :  { %348 = vst.msk [vmem:[#allocation3 + $0x4] sm:$0x3] %vm193_vm4, %v1058_v28  ;;  %937 = vmatmul.mubr.msk.f32.vlgmr.msra.gmra.mrb[4].mxu0 %vm109_vm3, %v1058_v28 }
 0x2b1   :  { %1026 = vmatpush3.bf16.msra.mxu0 %v1122_v7  ;;  %958 = vmatprep.mubr.msk.f32.mxu0 %vm1070_vm2, %v1071_v9 }
 0x2b2   :  { %1027 = vmatprep.subr.bf16.mxu0 %v1069_v3 }
 0x2b5   :  { %1029 = vmatpush3.bf16.msra.mxu0 %v1132_v10 }
 0x2b6   :  { %1036 = vmatprep.subr.bf16.mxu0 %v1069_v3 }
 0x383   :  { %v419_v30 = vpop.f32.mrb[4].mxu0 }
 0x384   :  { %v423_v31 = vadd.f32 %v419_v30, %v349_v29  ;;  %v938_v32 = vpop.f32.mrb[5].mxu0 }
 0x386   :  { %1059 = vtanh.f32 %v423_v31 }
 0x390   :  { %v1060_v33 = vpop.eup %1059 }
 0x391   :  { %425 = vst.msk [vmem:[#allocation3 + $0x6] sm:$0x3] %vm193_vm4, %v1060_v33  ;;  %948 = vmatmul.mubr.msk.f32.vlgmr.msra.gmra.mrb[4].mxu1 %vm109_vm3, %v1060_v33 }
 0x392   :  { %1032 = vmatpush3.bf16.msra.mxu1 %v1122_v7  ;;  %969 = vmatprep.mubr.msk.f32.mxu1 %vm1070_vm2, %v1071_v9 }
 0x393   :  { %1033 = vmatprep.subr.bf16.mxu1 %v1069_v3 }
 0x396   :  { %1035 = vmatpush3.bf16.msra.mxu1 %v1132_v10 }
 0x397   :  { %1043 = vmatprep.subr.bf16.mxu1 %v1042_v53 }
 0x398   :  { %v734_v44 = vld [vmem:[#allocation3] sm:$0xff] }
 0x464   :  { %v496_v35 = vpop.f32.mrb[4].mxu1 }
 0x465   :  { %v500_v36 = vadd.f32 %v496_v35, %v426_v34  ;;  %v949_v37 = vpop.f32.mrb[5].mxu1 }
 0x467   :  { %1061 = vtanh.f32 %v500_v36 }
 0x471   :  { %v1062_v38 = vpop.eup %1061 }
 0x472   :  { %502 = vst.msk [vmem:[#allocation3 + $0x8] sm:$0x3] %vm193_vm4, %v1062_v38  ;;  %959 = vmatmul.mubr.msk.f32.vlgmr.msra.gmra.mrb[6].mxu0 %vm109_vm3, %v1062_v38 }
 0x473   :  { %1038 = vmatpush3.bf16.msra.mxu0 %v1122_v7  ;;  %980 = vmatprep.mubr.msk.f32.mxu0 %vm1070_vm2, %v1071_v9 }
 0x474   :  { %1039 = vmatprep.subr.bf16.mxu0 %v1069_v3 }
 0x477   :  { %1041 = vmatpush3.bf16.msra.mxu0 %v1132_v10 }
 0x545   :  { %v573_v40 = vpop.f32.mrb[6].mxu0 }
 0x546   :  { %v577_v41 = vadd.f32 %v573_v40, %v503_v39  ;;  %v960_v42 = vpop.f32.mrb[7].mxu0 }
 0x548   :  { %1063 = vtanh.f32 %v577_v41 }
 0x552   :  { %v1064_v43 = vpop.eup %1063 }
 0x553   :  { %579 = vst.msk [vmem:[#allocation3 + $0xa] sm:$0x3] %vm193_vm4, %v1064_v43  ;;  %970 = vmatmul.mubr.msk.f32.vlgmr.msra.gmra.mrb[6].mxu1 %vm109_vm3, %v1064_v43 }
 0x554   :  { %991 = vmatprep.mubr.msk.f32.mxu1 %vm109_vm3, %v734_v44  ;;  %1045 = vmatpush3.bf16.msra.mxu1 %v1042_v53 }
 0x555   :  { %1047 = vmatprep.subr.bf16.mxu1 %v1046_v55 }
 0x558   :  { %1049 = vmatpush3.bf16.msra.mxu1 %v1046_v55 }
 0x626   :  { %v650_v46 = vpop.f32.mrb[6].mxu1 }
 0x627   :  { %v654_v47 = vadd.f32 %v650_v46, %v580_v45  ;;  %v971_v48 = vpop.f32.mrb[7].mxu1 }
 0x629   :  { %1065 = vtanh.f32 %v654_v47 }
 0x633   :  { %v1066_v49 = vpop.eup %1065 }
 0x634   :  { %656 = vst.msk [vmem:[#allocation3 + $0xc] sm:$0x3] %vm193_vm4, %v1066_v49  ;;  %981 = vmatmul.mubr.msk.f32.vlgmr.msra.gmra.mrb[8].mxu0 %vm109_vm3, %v1066_v49 }
 0x707   :  { %v727_v57 = vpop.f32.mrb[8].mxu0 }
 0x708   :  { %v731_v58 = vadd.f32 %v727_v57, %v657_v56  ;;  %v982_v59 = vpop.f32.mrb[9].mxu0 }
 0x70a   :  { %1067 = vtanh.f32 %v731_v58 }
 0x714   :  { %v1068_v60 = vpop.eup %1067 }
 0x715   :  { %733 = vst.msk [vmem:[#allocation3 + $0xe] sm:$0x3] %vm193_vm4, %v1068_v60 }
 0x71c   :  { %v735_v61 = vld [vmem:[#allocation3 + $0x8] sm:$0xff] }
 0x71d   :  { %992 = vmatmul.mubr.msk.f32.vlgmr.msra.gmra.mrb[8].mxu1 %vm109_vm3, %v735_v61 }
 0x7f0   :  { %v993_v62 = vpop.f32.mrb[8].mxu1 }
 0x7f1   :  { %823 = vst.msk [vmem:[%s1223_s5 + $0x8] sm:$0xff] %vm821_vm5, %v993_v62  ;;  %v812_v63 = vpop.f32.mrb[9].mxu1 }
 0x7f2   :  { %822 = vst.msk [vmem:[%s1223_s5] sm:$0xff] %vm821_vm5, %v812_v63 }

</bundles_post_ra>
